<compile_context>
chip_gen: v7x
topology: tpu7x:2x2x1
jax: 0.10.0
libtpu: 0.0.40
codegen_flags: <defaults>
</compile_context>

<pallas_src>
import jax
import jax.numpy as jnp
import numpy as np
from jax.experimental import pallas as pl
from jax.experimental.pallas import tpu as pltpu


def _round_up(x, m):
    return ((x + m - 1) // m) * m


# ---------------------------------------------------------------------------
# Fused kernel: y = (x @ W.T) * min(1, softplus(c) / rowsumL1(W)) + bias
# ---------------------------------------------------------------------------
def _lip_linear_kernel(sp_ref, x_ref, w_ref, b_ref, o_ref, acc_ref, rsum_ref):
    k = pl.program_id(2)

    @pl.when(k == 0)
    def _():
        acc_ref[...] = jnp.zeros_like(acc_ref)
        rsum_ref[...] = jnp.zeros_like(rsum_ref)

    w = w_ref[...]                                    # (tn, tk), native MXU dtype

    # Main matmul, contracting K vs K (no in-kernel transpose of the W tile),
    # native-dtype MXU operands, f32 accumulation.
    acc_ref[...] += jax.lax.dot_general(
        x_ref[...], w,
        dimension_numbers=(((1,), (1,)), ((), ())),
        preferred_element_type=jnp.float32,
    )

    # Row-L1 accumulation of |W| for the Lipschitz scale, produced lane-dense
    # as (8, tn) via a tiny MXU matvec (8/tm of the main matmul's MXU work,
    # hides under its slack).  All 8 rows are identical; row 0 is used below.
    ones_blk = jnp.ones((8, w.shape[1]), dtype=w.dtype)
    rsum_ref[...] += jax.lax.dot_general(
        ones_blk, jnp.abs(w),
        dimension_numbers=(((1,), (1,)), ((), ())),
        preferred_element_type=jnp.float32,
    )

    @pl.when(k == pl.num_programs(2) - 1)
    def _():
        # Cheap O(tm*tn) epilogue on the f32 accumulator: scale + f32 bias.
        absrowsum = jnp.maximum(rsum_ref[0:1, :], 1e-16)      # (1, tn) lane-dense
        scale = jnp.minimum(1.0, sp_ref[0, 0] / absrowsum)    # softplus(c) from SMEM
        o_ref[...] = (acc_ref[...] * scale + b_ref[...]).astype(o_ref.dtype)


def lip_linear(x, weight, bias, c, *, tm=512, tn=512, tk=1024, mxu_dtype=None):
    """x: (..., K), weight: (N, K), bias: (N,), c: scalar -> (..., N).

    mxu_dtype: optional lower-precision dtype (e.g. jnp.bfloat16) for the MXU
    operands x / W.  Accumulation, scale and bias stay in f32.
    """
    x = jnp.asarray(x)
    weight = jnp.asarray(weight)
    bias = jnp.asarray(bias)
    c = jnp.asarray(c, jnp.float32).reshape(())

    lead_shape = x.shape[:-1]
    x2 = x.reshape(-1, x.shape[-1])
    B, K = x2.shape
    N, K2 = weight.shape
    assert K == K2 and bias.shape == (N,)
    out_dtype = x.dtype
    mxu_dt = jnp.dtype(mxu_dtype) if mxu_dtype is not None else x.dtype

    # Tile sizes: lane dims 256-aligned (v6e/v7x MXU is 2x256x256; 128-aligned
    # would suffice for v5e's 4x128x128), batch dim 8-aligned, all clamped to
    # the padded problem extents for small shapes.
    tm = int(min(tm, _round_up(B, 8)))
    tn = int(min(tn, _round_up(N, 256)))
    tk = int(min(tk, _round_up(K, 256)))

    Bp, Np, Kp = _round_up(B, tm), _round_up(N, tn), _round_up(K, tk)

    x_p = x2 if (Bp == B and Kp == K) else jnp.pad(x2, ((0, Bp - B), (0, Kp - K)))
    w_p = (weight if (Np == N and Kp == K)
           else jnp.pad(weight, ((0, Np - N), (0, Kp - K))))
    if x_p.dtype != mxu_dt:
        x_p = x_p.astype(mxu_dt)
    if w_p.dtype != mxu_dt:
        w_p = w_p.astype(mxu_dt)
    b_p = jnp.pad(bias.astype(jnp.float32), (0, Np - N)).reshape(1, Np)

    # softplus(c): a single scalar op in the wrapper, passed via SMEM.
    sp_c = jax.nn.softplus(c).astype(jnp.float32).reshape(1, 1)

    # Raise the scoped-VMEM limit to cover the double-buffered tiles
    # (v5e's default is only 16 MiB); cap at v7x's 64 MiB physical VMEM.
    in_bpe = jnp.dtype(mxu_dt).itemsize
    out_bpe = jnp.dtype(out_dtype).itemsize
    vmem_need = (2 * (tm * tk + tn * tk) * in_bpe    # double-buffered x, W
                 + 2 * tm * tn * out_bpe             # double-buffered out
                 + 4 * tn * 4                        # double-buffered bias
                 + tm * tn * 4 + 8 * tn * 4)         # scratch: acc + row sums
    vmem_limit = int(min(64 * 1024 * 1024,
                         max(32 * 1024 * 1024, vmem_need * 5 // 4)))

    out_p = pl.pallas_call(
        _lip_linear_kernel,
        out_shape=jax.ShapeDtypeStruct((Bp, Np), out_dtype),
        grid_spec=pltpu.PrefetchScalarGridSpec(
            num_scalar_prefetch=0,
            grid=(Bp // tm, Np // tn, Kp // tk),
            in_specs=[
                pl.BlockSpec(memory_space=pltpu.MemorySpace.SMEM),   # softplus(c)
                pl.BlockSpec((tm, tk), lambda i, j, k: (i, k)),      # x
                pl.BlockSpec((tn, tk), lambda i, j, k: (j, k)),      # W
                pl.BlockSpec((1, tn), lambda i, j, k: (0, j)),       # bias (f32)
            ],
            out_specs=pl.BlockSpec((tm, tn), lambda i, j, k: (i, j)),
            scratch_shapes=[
                pltpu.VMEM((tm, tn), jnp.float32),   # f32 matmul accumulator
                pltpu.VMEM((8, tn), jnp.float32),    # lane-dense |W| row sums
            ],
        ),
        compiler_params=pltpu.CompilerParams(
            dimension_semantics=("parallel", "parallel", "arbitrary"),
            vmem_limit_bytes=vmem_limit,
        ),
    )(sp_c, x_p, w_p, b_p)

    return out_p[:B, :N].reshape(*lead_shape, N)


# ---------------------------------------------------------------------------
# Reference + tests
# ---------------------------------------------------------------------------
def _reference(x, weight, bias, c):
    absrowsum = jnp.maximum(jnp.sum(jnp.abs(weight), axis=1), 1e-16)
    scale = jnp.minimum(jnp.ones_like(absrowsum), jax.nn.softplus(c) / absrowsum)
    w_normed = weight * scale[:, None]
    return x @ w_normed.T + bias[None, :]


def _run_case(key, batch, in_features, out_features, c_value=None,
              atol=5e-4, rtol=5e-4, **kwargs):
    k_x, k_w = jax.random.split(key)
    bound = float(np.sqrt(6.0 / (in_features + out_features)))
    weight = jax.random.uniform(
        k_w, (out_features, in_features), jnp.float32, minval=-bound, maxval=bound
    )
    bias = jnp.zeros((out_features,), jnp.float32)
    if c_value is None:
        c = jnp.max(jnp.sum(jnp.abs(weight), axis=1))   # matches reset_parameters()
    else:
        c = jnp.float32(c_value)
    x = jax.random.normal(k_x, (batch, in_features), jnp.float32)

    out = jax.block_until_ready(lip_linear(x, weight, bias, c, **kwargs))
    ref = _reference(x, weight, bias, c)
    assert out.shape == (batch, out_features)
    err = np.max(np.abs(np.asarray(out) - np.asarray(ref)))
    assert np.allclose(np.asarray(out), np.asarray(ref), atol=atol, rtol=rtol), err


if __name__ == "__main__":
    key = jax.random.PRNGKey(0)
    k1, k2, k3 = jax.random.split(key, 3)

    # Small case matching the module's toy sizes (single-tile grid, scale == 1).
    _run_case(k1, batch=8, in_features=32, out_features=16)

    # Multi-tile grid (3 x 2 x 2) exercising K-axis accumulation, N/K padding
    # and the scale < 1 branch, with small forced tiles.
    _run_case(k2, batch=48, in_features=300, out_features=320,
              c_value=1.0, tm=16, tn=256, tk=256)

    # Optional bf16 MXU-operand path (f32 accumulation / scale / bias).
    _run_case(k3, batch=128, in_features=512, out_features=256,
              c_value=2.0, mxu_dtype=jnp.bfloat16, atol=5e-2, rtol=5e-2)

    print("KERNEL_OK")
</pallas_src>

<mosaic_0001>
module attributes {stable_mosaic.version = 11 : i64} {
  func.func @_lip_linear_kernel(%arg0: i32, %arg1: i32, %arg2: i32, %arg3: memref<1x1xf32, #tpu.memory_space<smem>>, %arg4: memref<8x256xf32, #tpu.memory_space<vmem>>, %arg5: memref<256x256xf32, #tpu.memory_space<vmem>>, %arg6: memref<1x256xf32, #tpu.memory_space<vmem>>, %arg7: memref<8x256xf32, #tpu.memory_space<vmem>>, %arg8: memref<8x256xf32, #tpu.memory_space<vmem>>, %arg9: memref<8x256xf32, #tpu.memory_space<vmem>>) attributes {dimension_semantics = [#tpu.dimension_semantics<parallel>, #tpu.dimension_semantics<parallel>, #tpu.dimension_semantics<arbitrary>], iteration_bounds = array<i64: 1, 1, 1>, scalar_prefetch = 0 : i64, scratch_operands = 2 : i64, tpu.core_type = #tpu.core_type<tc>, window_params = [{transform_indices = @transform_0, window_bounds = array<i64: 1, 1>}, {transform_indices = @transform_1, window_bounds = array<i64: 8, 256>}, {transform_indices = @transform_2, window_bounds = array<i64: 256, 256>}, {transform_indices = @transform_3, window_bounds = array<i64: 1, 256>}, {transform_indices = @transform_4, window_bounds = array<i64: 8, 256>}]} {
    %c0_i32 = arith.constant 0 : i32
    %0 = arith.cmpi eq, %arg2, %c0_i32 : i32
    %1 = arith.extui %0 : i1 to i32
    %c0_i32_0 = arith.constant 0 : i32
    %2 = arith.cmpi ne, %1, %c0_i32_0 : i32
    scf.if %2 {
      %cst_16 = arith.constant 0.000000e+00 : f32
      %18 = vector.broadcast %cst_16 : f32 to vector<8x256xf32>
      %c0_17 = arith.constant 0 : index
      %c0_18 = arith.constant 0 : index
      %19 = vector.load %arg8[%c0_17, %c0_18] : memref<8x256xf32, #tpu.memory_space<vmem>>, vector<8x256xf32>
      tpu.vector_store %arg8[%c0_17, %c0_18], %18 {strides = array<i32>} : memref<8x256xf32, #tpu.memory_space<vmem>>, vector<8x256xf32>,
      %cst_19 = arith.constant 0.000000e+00 : f32
      %20 = vector.broadcast %cst_19 : f32 to vector<8x256xf32>
      %c0_20 = arith.constant 0 : index
      %c0_21 = arith.constant 0 : index
      %21 = vector.load %arg9[%c0_20, %c0_21] : memref<8x256xf32, #tpu.memory_space<vmem>>, vector<8x256xf32>
      tpu.vector_store %arg9[%c0_20, %c0_21], %20 {strides = array<i32>} : memref<8x256xf32, #tpu.memory_space<vmem>>, vector<8x256xf32>,
    } else {
    }
    %c0 = arith.constant 0 : index
    %c0_1 = arith.constant 0 : index
    %3 = vector.load %arg5[%c0, %c0_1] : memref<256x256xf32, #tpu.memory_space<vmem>>, vector<256x256xf32>
    %c0_2 = arith.constant 0 : index
    %c0_3 = arith.constant 0 : index
    %4 = vector.load %arg8[%c0_2, %c0_3] : memref<8x256xf32, #tpu.memory_space<vmem>>, vector<8x256xf32>
    %c0_4 = arith.constant 0 : index
    %c0_5 = arith.constant 0 : index
    %5 = vector.load %arg4[%c0_4, %c0_5] : memref<8x256xf32, #tpu.memory_space<vmem>>, vector<8x256xf32>
    %cst = arith.constant dense<0.000000e+00> : vector<8x256xf32>
    %6 = tpu.matmul %5, %3, %cst {dimension_numbers = #tpu.dot_dimension_numbers<[1], [1], [0], [0], [0, 0, 1, 0], [], []>} : vector<8x256xf32>, vector<256x256xf32>, vector<8x256xf32> -> vector<8x256xf32>
    %7 = arith.addf %4, %6 : vector<8x256xf32>
    %c0_6 = arith.constant 0 : index
    %c0_7 = arith.constant 0 : index
    %8 = vector.load %arg8[%c0_6, %c0_7] : memref<8x256xf32, #tpu.memory_space<vmem>>, vector<8x256xf32>
    tpu.vector_store %arg8[%c0_6, %c0_7], %7 {strides = array<i32>} : memref<8x256xf32, #tpu.memory_space<vmem>>, vector<8x256xf32>,
    %cst_8 = arith.constant 1.000000e+00 : f32
    %9 = vector.broadcast %cst_8 : f32 to vector<8x256xf32>
    %c0_9 = arith.constant 0 : index
    %c0_10 = arith.constant 0 : index
    %10 = vector.load %arg9[%c0_9, %c0_10] : memref<8x256xf32, #tpu.memory_space<vmem>>, vector<8x256xf32>
    %11 = math.absf %3 : vector<256x256xf32>
    %cst_11 = arith.constant dense<0.000000e+00> : vector<8x256xf32>
    %12 = tpu.matmul %9, %11, %cst_11 {dimension_numbers = #tpu.dot_dimension_numbers<[1], [1], [0], [0], [0, 0, 1, 0], [], []>} : vector<8x256xf32>, vector<256x256xf32>, vector<8x256xf32> -> vector<8x256xf32>
    %13 = arith.addf %10, %12 : vector<8x256xf32>
    %c0_12 = arith.constant 0 : index
    %c0_13 = arith.constant 0 : index
    %14 = vector.load %arg9[%c0_12, %c0_13] : memref<8x256xf32, #tpu.memory_space<vmem>>, vector<8x256xf32>
    tpu.vector_store %arg9[%c0_12, %c0_13], %13 {strides = array<i32>} : memref<8x256xf32, #tpu.memory_space<vmem>>, vector<8x256xf32>,
    %c0_i32_14 = arith.constant 0 : i32
    %15 = arith.cmpi eq, %arg2, %c0_i32_14 : i32
    %16 = arith.extui %15 : i1 to i32
    %c0_i32_15 = arith.constant 0 : i32
    %17 = arith.cmpi ne, %16, %c0_i32_15 : i32
    scf.if %17 {
      %c0_16 = arith.constant 0 : index
      %c0_17 = arith.constant 0 : index
      %18 = vector.load %arg9[%c0_16, %c0_17] : memref<8x256xf32, #tpu.memory_space<vmem>>, vector<1x256xf32>
      %cst_18 = arith.constant 1.000000e-16 : f32
      %19 = vector.broadcast %cst_18 : f32 to vector<1x256xf32>
      %20 = arith.maximumf %18, %19 : vector<1x256xf32>
      %c0_19 = arith.constant 0 : index
      %c0_20 = arith.constant 0 : index
      %21 = memref.load %arg3[%c0_19, %c0_20] : memref<1x1xf32, #tpu.memory_space<smem>>
      %22 = vector.broadcast %21 : f32 to vector<1x256xf32>
      %23 = arith.divf %22, %20 : vector<1x256xf32>
      %cst_21 = arith.constant 1.000000e+00 : f32
      %24 = vector.broadcast %cst_21 : f32 to vector<1x256xf32>
      %25 = arith.minimumf %24, %23 : vector<1x256xf32>
      %c0_22 = arith.constant 0 : index
      %c0_23 = arith.constant 0 : index
      %26 = vector.load %arg8[%c0_22, %c0_23] : memref<8x256xf32, #tpu.memory_space<vmem>>, vector<8x256xf32>
      %27 = vector.broadcast %25 : vector<1x256xf32> to vector<8x256xf32>
      %28 = arith.mulf %26, %27 : vector<8x256xf32>
      %c0_24 = arith.constant 0 : index
      %c0_25 = arith.constant 0 : index
      %29 = vector.load %arg6[%c0_24, %c0_25] : memref<1x256xf32, #tpu.memory_space<vmem>>, vector<1x256xf32>
      %30 = vector.broadcast %29 : vector<1x256xf32> to vector<8x256xf32>
      %31 = arith.addf %28, %30 : vector<8x256xf32>
      %c0_26 = arith.constant 0 : index
      %c0_27 = arith.constant 0 : index
      %32 = vector.load %arg7[%c0_26, %c0_27] : memref<8x256xf32, #tpu.memory_space<vmem>>, vector<8x256xf32>
      tpu.vector_store %arg7[%c0_26, %c0_27], %31 {strides = array<i32>} : memref<8x256xf32, #tpu.memory_space<vmem>>, vector<8x256xf32>,
    } else {
    }
    return
  }
  func.func @transform_0(%arg0: i32, %arg1: i32, %arg2: i32) -> (i32, i32) {
    %c0_i32 = arith.constant 0 : i32
    %c0_i32_0 = arith.constant 0 : i32
    %c0_i32_1 = arith.constant 0 : i32
    return %c0_i32, %c0_i32_0 : i32, i32
  }
  func.func @transform_1(%arg0: i32, %arg1: i32, %arg2: i32) -> (i32, i32) {
    %c0_i32 = arith.constant 0 : i32
    return %arg0, %arg2 : i32, i32
  }
  func.func @transform_2(%arg0: i32, %arg1: i32, %arg2: i32) -> (i32, i32) {
    %c0_i32 = arith.constant 0 : i32
    return %arg1, %arg2 : i32, i32
  }
  func.func @transform_3(%arg0: i32, %arg1: i32, %arg2: i32) -> (i32, i32) {
    %c0_i32 = arith.constant 0 : i32
    %c0_i32_0 = arith.constant 0 : i32
    return %c0_i32, %arg1 : i32, i32
  }
  func.func @transform_4(%arg0: i32, %arg1: i32, %arg2: i32) -> (i32, i32) {
    %c0_i32 = arith.constant 0 : i32
    return %arg0, %arg1 : i32, i32
  }
}

</mosaic_0001>

<bundles_post_ra>
// kernel: tpu_custom_call.1
= control target key start
LH: loop header
LB: loop body
LE: loop exit
PB: predicated region body
PF: predicated region fallthrough
CT: control target
= control target key end

     0   :  { %10 = vsyncpa [#allocation6], 0  ;;  %s685_s0 = inlined_call_operand.<no memory space> [shape: f32[1,1], index: 0, kind: input, shape index: {}]   ;;  %s686_s1 = inlined_call_operand.hbm [shape: f32[8,256], index: 1, kind: input, shape index: {}]   ;;  %s687_s2 = inlined_call_operand.hbm [shape: f32[256,256], index: 2, kind: input, shape index: {}]   ;;  %s688_s3 = inlined_call_operand.vmem [shape: f32[1,256], index: 3, kind: input, shape index: {}]   ;;  %s689_s4 = inlined_call_operand.hbm [shape: f32[8,256], index: 4, kind: output, shape index: {}]  }
   0x1   :  { %11 = vsyncpa [#allocation9], 0 }
   0x2   :  { %12 = vsyncpa [#allocation7], 0  ;;  %s603_s15 = smov [#allocation5]   ;;  %s604_s17 = smov [#allocation8]  }
   0x3   :  { %s21_s16 = sshll.u32 %s603_s15, 4  ;;  %s30_s18 = sshll.u32 %s604_s17, 4  ;;  %s22_s16 = int_to_ptr.vmem [resolvable:$true] %s21_s16  ;;  %s634_s18 = int_to_ptr.vmem [resolvable:$true] %s30_s18 }
   0x4   :  { %s531_s21 = scalar_lea.hbm %s686_s1, 256 }
   0x5   :  { %p532_p0 = scmp.ne.s32.totalorder %s686_s1, %s531_s21  ;;  %p535_p1 = scmp.lt.u32.totalorder %s531_s21, %s686_s1 }
   0x7   :  { %p537_p2 = pnand %p535_p1, %p532_p0 }
   0x9   :  { %540 = shalt.err (!%p537_p2)
}
   0xa   :  { %s541_s26 = scalar_lea.vmem %s22_s16, 256  ;;  %p546_p4 = scmp.lt.s32.totalorder %s22_s16, %s22_s16 }
   0xb   :  { %p542_p3 = scmp.ne.s32.totalorder %s22_s16, %s541_s26  ;;  %p547_p5 = scmp.lt.s32.totalorder %s541_s26, %s541_s26 }
   0xd   :  { %p548_p6 = por %p547_p5, %p546_p4 }
   0xf   :  { %p549_p7 = pnand %p548_p6, %p542_p3 }
  0x11   :  { %552 = shalt.err (!%p549_p7)
}
  0x12   :  { %24 = dma.hbm_to_vmem [thread:$0]  %s686_s1, 256, %s22_s16, [#allocation6]  }
  0x13   :  { %s553_s5 = scalar_lea.hbm %s687_s2, 8192 }
  0x14   :  { %p554_p8 = scmp.ne.s32.totalorder %s687_s2, %s553_s5  ;;  %p557_p9 = scmp.lt.u32.totalorder %s553_s5, %s687_s2 }
  0x16   :  { %p559_p10 = pnand %p557_p9, %p554_p8 }
  0x18   :  { %562 = shalt.err (!%p559_p10)
}
  0x19   :  { %s563_s10 = scalar_lea.vmem %s634_s18, 8192  ;;  %p568_p12 = scmp.lt.s32.totalorder %s634_s18, %s634_s18 }
  0x1a   :  { %p564_p11 = scmp.ne.s32.totalorder %s634_s18, %s563_s10  ;;  %p569_p13 = scmp.lt.s32.totalorder %s563_s10, %s563_s10 }
  0x1c   :  { %p570_p0 = por %p569_p13, %p568_p12 }
  0x1e   :  { %p571_p1 = pnand %p570_p0, %p564_p11 }
  0x20   :  { %574 = shalt.err (!%p571_p1)
}
  0x21   :  { %s605_s1 = smov 256   ;;  %s606_s11 = smov 16  }
  0x22   :  { %36 = dma.hbm_to_vmem [thread:$0]  %s687_s2, 8192, %s634_s18, [#allocation9], %s605_s1, %s605_s1, %s606_s11  }
  0x23   :  { %597 = dma.done.wait [#allocation6], 256  }
  0x24   :  { %598 = vsyncadd [#allocation6], 4294967040 }
  0x25   :  { %599 = dma.done.wait [#allocation9], 8192  }
  0x26   :  { %600 = vsyncadd [#allocation9], 4294959104  ;;  %v607_v0 = vmov 1.0   ;;  %v54_v1 = vld [vmem:[#allocation8 + $0x8] sm:$0xff]  ;;  %v56_v2 = vld [vmem:[#allocation8 + $0x18] sm:$0xff]  ;;  %s608_s17 = smov [#allocation10]  }
  0x27   :  { %326 = vmatprep.mubr.f32.mxu1 %v607_v0  ;;  %v53_v3 = vld [vmem:[#allocation8] sm:$0xff]  ;;  %v199_v4 = vand.u32 2147483647, %v54_v1  ;;  %v201_v5 = vand.u32 2147483647, %v56_v2  ;;  %v55_v6 = vld [vmem:[#allocation8 + $0x10] sm:$0xff]  ;;  %v394_v8 = vpack.c.bf16 %v56_v2, %v54_v1 }
  0x28   :  { %v58_v7 = vld [vmem:[#allocation8 + $0x28] sm:$0xff]  ;;  %v198_v9 = vand.u32 2147483647, %v53_v3  ;;  %v200_v10 = vand.u32 2147483647, %v55_v6  ;;  %v60_v11 = vld [vmem:[#allocation8 + $0x38] sm:$0xff]  ;;  %v396_v12 = vpack.c.bf16 %v55_v6, %v53_v3 }
  0x29   :  { %v458_v13 = vpack.c.bf16 %v201_v5, %v199_v4  ;;  %v203_v14 = vand.u32 2147483647, %v58_v7  ;;  %v205_v15 = vand.u32 2147483647, %v60_v11  ;;  %v57_v16 = vld [vmem:[#allocation8 + $0x20] sm:$0xff]  ;;  %v59_v17 = vld [vmem:[#allocation8 + $0x30] sm:$0xff]  ;;  %395 = vmatprep.subr.bf16.mxu0 %v394_v8  ;;  %v398_v18 = vpack.c.bf16 %v60_v11, %v58_v7 }
  0x2a   :  { %v460_v19 = vpack.c.bf16 %v200_v10, %v198_v9  ;;  %v62_v20 = vld [vmem:[#allocation8 + $0x48] sm:$0xff]  ;;  %v64_v21 = vld [vmem:[#allocation8 + $0x58] sm:$0xff]  ;;  %397 = vmatpush1.bf16.xpose.msra.mxu0 %v396_v12  ;;  %v202_v23 = vand.u32 2147483647, %v57_v16  ;;  %v204_v24 = vand.u32 2147483647, %v59_v17  ;;  %v400_v27 = vpack.c.bf16 %v59_v17, %v57_v16 }
  0x2b   :  { %459 = vmatprep.subr.bf16.mxu1 %v458_v13  ;;  %v462_v22 = vpack.c.bf16 %v205_v15, %v203_v14  ;;  %399 = vmatprep.subr.bf16.mxu0 %v398_v18  ;;  %v207_v25 = vand.u32 2147483647, %v62_v20  ;;  %v209_v26 = vand.u32 2147483647, %v64_v21  ;;  %v402_v28 = vpack.c.bf16 %v64_v21, %v62_v20  ;;  %v61_v31 = vld [vmem:[#allocation8 + $0x40] sm:$0xff]  ;;  %v63_v32 = vld [vmem:[#allocation8 + $0x50] sm:$0xff] }
  0x2c   :  { %461 = vmatpush1.bf16.xpose.msra.mxu1 %v460_v19  ;;  %v464_v29 = vpack.c.bf16 %v204_v24, %v202_v23  ;;  %v66_v33 = vld [vmem:[#allocation8 + $0x68] sm:$0xff]  ;;  %v68_v34 = vld [vmem:[#allocation8 + $0x78] sm:$0xff]  ;;  %v206_v35 = vand.u32 2147483647, %v61_v31  ;;  %v208_v36 = vand.u32 2147483647, %v63_v32  ;;  %v404_v39 = vpack.c.bf16 %v63_v32, %v61_v31 }
  0x2d   :  { %463 = vmatprep.subr.bf16.mxu1 %v462_v22  ;;  %v466_v30 = vpack.c.bf16 %v209_v26, %v207_v25  ;;  %v211_v37 = vand.u32 2147483647, %v66_v33  ;;  %v213_v38 = vand.u32 2147483647, %v68_v34  ;;  %v406_v40 = vpack.c.bf16 %v68_v34, %v66_v33  ;;  %v65_v43 = vld [vmem:[#allocation8 + $0x60] sm:$0xff]  ;;  %v67_v44 = vld [vmem:[#allocation8 + $0x70] sm:$0xff] }
  0x2e   :  { %v468_v41 = vpack.c.bf16 %v208_v36, %v206_v35  ;;  %v70_v45 = vld [vmem:[#allocation8 + $0x88] sm:$0xff]  ;;  %v72_v46 = vld [vmem:[#allocation8 + $0x98] sm:$0xff]  ;;  %v210_v47 = vand.u32 2147483647, %v65_v43  ;;  %v212_v48 = vand.u32 2147483647, %v67_v44  ;;  %v408_v51 = vpack.c.bf16 %v67_v44, %v65_v43 }
  0x2f   :  { %v470_v42 = vpack.c.bf16 %v213_v38, %v211_v37  ;;  %v215_v49 = vand.u32 2147483647, %v70_v45  ;;  %v217_v50 = vand.u32 2147483647, %v72_v46  ;;  %v410_v52 = vpack.c.bf16 %v72_v46, %v70_v45  ;;  %v69_v55 = vld [vmem:[#allocation8 + $0x80] sm:$0xff]  ;;  %v71_v56 = vld [vmem:[#allocation8 + $0x90] sm:$0xff] }
  0x30   :  { %v472_v53 = vpack.c.bf16 %v212_v48, %v210_v47  ;;  %v74_v57 = vld [vmem:[#allocation8 + $0xa8] sm:$0xff]  ;;  %v76_v58 = vld [vmem:[#allocation8 + $0xb8] sm:$0xff]  ;;  %v214_v59 = vand.u32 2147483647, %v69_v55  ;;  %v216_v60 = vand.u32 2147483647, %v71_v56  ;;  %v412_v1 = vpack.c.bf16 %v71_v56, %v69_v55 }
  0x31   :  { %v474_v54 = vpack.c.bf16 %v217_v50, %v215_v49  ;;  %v219_v61 = vand.u32 2147483647, %v74_v57  ;;  %v221_v62 = vand.u32 2147483647, %v76_v58  ;;  %v120_v63 = vld [vmem:[#allocation5 + $0x8] sm:$0xff]  ;;  %v414_v2 = vpack.c.bf16 %v76_v58, %v74_v57  ;;  %v73_v5 = vld [vmem:[#allocation8 + $0xa0] sm:$0xff] }
  0x32   :  { %401 = vmatpush1.bf16.xpose.msra.mxu0 %v400_v27  ;;  %185 = vmatprep.mubr.f32.mxu0 %v120_v63  ;;  %v476_v3 = vpack.c.bf16 %v216_v60, %v214_v59  ;;  %v75_v6 = vld [vmem:[#allocation8 + $0xb0] sm:$0xff]  ;;  %v78_v7 = vld [vmem:[#allocation8 + $0xc8] sm:$0xff]  ;;  %v80_v8 = vld [vmem:[#allocation8 + $0xd8] sm:$0xff]  ;;  %v218_v9 = vand.u32 2147483647, %v73_v5  ;;  %s384_s18 = sshll.u32 %s608_s17, 4  ;;  %s385_s18 = int_to_ptr.vmem [resolvable:$true] %s384_s18 }
  0x33   :  { %403 = vmatprep.subr.bf16.mxu0 %v402_v28  ;;  %v478_v4 = vpack.c.bf16 %v221_v62, %v219_v61  ;;  %v220_v10 = vand.u32 2147483647, %v75_v6  ;;  %v223_v11 = vand.u32 2147483647, %v78_v7  ;;  %v225_v12 = vand.u32 2147483647, %v80_v8  ;;  %p580_p3 = scmp.lt.s32.totalorder %s385_s18, %s385_s18 }
  0x34   :  { %465 = vmatpush1.bf16.xpose.msra.mxu1 %v464_v29  ;;  %v416_v13 = vpack.c.bf16 %v75_v6, %v73_v5  ;;  %v418_v14 = vpack.c.bf16 %v80_v8, %v78_v7  ;;  %v77_v17 = vld [vmem:[#allocation8 + $0xc0] sm:$0xff]  ;;  %v79_v18 = vld [vmem:[#allocation8 + $0xd0] sm:$0xff]  ;;  %v82_v19 = vld [vmem:[#allocation8 + $0xe8] sm:$0xff] }
  0x35   :  { %467 = vmatprep.subr.bf16.mxu1 %v466_v30  ;;  %v480_v15 = vpack.c.bf16 %v220_v10, %v218_v9  ;;  %v482_v16 = vpack.c.bf16 %v225_v12, %v223_v11  ;;  %v84_v20 = vld [vmem:[#allocation8 + $0xf8] sm:$0xff]  ;;  %v222_v21 = vand.u32 2147483647, %v77_v17  ;;  %v224_v22 = vand.u32 2147483647, %v79_v18  ;;  %v81_v29 = vld [vmem:[#allocation8 + $0xe0] sm:$0xff] }
  0x36   :  { %v227_v23 = vand.u32 2147483647, %v82_v19  ;;  %v229_v24 = vand.u32 2147483647, %v84_v20  ;;  %v420_v25 = vpack.c.bf16 %v79_v18, %v77_v17  ;;  %v422_v26 = vpack.c.bf16 %v84_v20, %v82_v19  ;;  %v83_v30 = vld [vmem:[#allocation8 + $0xf0] sm:$0xff]  ;;  %v86_v31 = vld [vmem:[#allocation8 + $0x108] sm:$0xff] }
  0x37   :  { %v484_v27 = vpack.c.bf16 %v224_v22, %v222_v21  ;;  %v88_v32 = vld [vmem:[#allocation8 + $0x118] sm:$0xff]  ;;  %v226_v33 = vand.u32 2147483647, %v81_v29  ;;  %v228_v34 = vand.u32 2147483647, %v83_v30  ;;  %v424_v37 = vpack.c.bf16 %v83_v30, %v81_v29  ;;  %v90_v43 = vld [vmem:[#allocation8 + $0x128] sm:$0xff] }
  0x38   :  { %v486_v28 = vpack.c.bf16 %v229_v24, %v227_v23  ;;  %v231_v35 = vand.u32 2147483647, %v86_v31  ;;  %v233_v36 = vand.u32 2147483647, %v88_v32  ;;  %v426_v38 = vpack.c.bf16 %v88_v32, %v86_v31  ;;  %v92_v44 = vld [vmem:[#allocation8 + $0x138] sm:$0xff]  ;;  %v94_v55 = vld [vmem:[#allocation8 + $0x148] sm:$0xff] }
  0x39   :  { %v235_v47 = vand.u32 2147483647, %v90_v43  ;;  %v237_v48 = vand.u32 2147483647, %v92_v44  ;;  %v430_v50 = vpack.c.bf16 %v92_v44, %v90_v43  ;;  %v96_v56 = vld [vmem:[#allocation8 + $0x158] sm:$0xff] }
  0x3a   :  { %405 = vmatpush1.bf16.xpose.msra.mxu0 %v404_v39  ;;  %v488_v39 = vpack.c.bf16 %v228_v34, %v226_v33  ;;  %v239_v59 = vand.u32 2147483647, %v94_v55  ;;  %v241_v60 = vand.u32 2147483647, %v96_v56  ;;  %v434_v62 = vpack.c.bf16 %v96_v56, %v94_v55  ;;  %v100_v5 = vld [vmem:[#allocation8 + $0x178] sm:$0xff] }
  0x3b   :  { %407 = vmatprep.subr.bf16.mxu0 %v406_v40  ;;  %v490_v40 = vpack.c.bf16 %v233_v36, %v231_v35  ;;  %v245_v9 = vand.u32 2147483647, %v100_v5  ;;  %v104_v17 = vld [vmem:[#allocation8 + $0x198] sm:$0xff] }
  0x3c   :  { %469 = vmatpush1.bf16.xpose.msra.mxu1 %v468_v41  ;;  %v85_v41 = vld [vmem:[#allocation8 + $0x100] sm:$0xff]  ;;  %v249_v21 = vand.u32 2147483647, %v104_v17  ;;  %v108_v29 = vld [vmem:[#allocation8 + $0x1b8] sm:$0xff] }
  0x3d   :  { %471 = vmatprep.subr.bf16.mxu1 %v470_v42  ;;  %v87_v42 = vld [vmem:[#allocation8 + $0x110] sm:$0xff]  ;;  %v230_v45 = vand.u32 2147483647, %v85_v41  ;;  %v253_v33 = vand.u32 2147483647, %v108_v29 }
  0x3e   :  { %v232_v46 = vand.u32 2147483647, %v87_v42  ;;  %v428_v49 = vpack.c.bf16 %v87_v42, %v85_v41  ;;  %v112_v41 = vld [vmem:[#allocation8 + $0x1d8] sm:$0xff] }
  0x42   :  { %409 = vmatpush1.bf16.xpose.msra.mxu0 %v408_v51  ;;  %v492_v51 = vpack.c.bf16 %v232_v46, %v230_v45  ;;  %v257_v45 = vand.u32 2147483647, %v112_v41 }
  0x43   :  { %411 = vmatprep.subr.bf16.mxu0 %v410_v52  ;;  %v494_v52 = vpack.c.bf16 %v237_v48, %v235_v47 }
  0x44   :  { %473 = vmatpush1.bf16.xpose.msra.mxu1 %v472_v53  ;;  %v89_v53 = vld [vmem:[#allocation8 + $0x120] sm:$0xff] }
  0x45   :  { %475 = vmatprep.subr.bf16.mxu1 %v474_v54  ;;  %v91_v54 = vld [vmem:[#allocation8 + $0x130] sm:$0xff]  ;;  %v234_v57 = vand.u32 2147483647, %v89_v53 }
  0x46   :  { %v236_v58 = vand.u32 2147483647, %v91_v54  ;;  %v432_v61 = vpack.c.bf16 %v91_v54, %v89_v53  ;;  %v116_v53 = vld [vmem:[#allocation8 + $0x1f8] sm:$0xff] }
  0x48   :  { %v496_v63 = vpack.c.bf16 %v236_v58, %v234_v57  ;;  %v261_v57 = vand.u32 2147483647, %v116_v53 }
  0x4a   :  { %413 = vmatpush1.bf16.xpose.msra.mxu0 %v412_v1  ;;  %v498_v1 = vpack.c.bf16 %v241_v60, %v239_v59 }
  0x4b   :  { %415 = vmatprep.subr.bf16.mxu0 %v414_v2  ;;  %v93_v2 = vld [vmem:[#allocation8 + $0x140] sm:$0xff] }
  0x4c   :  { %477 = vmatpush1.bf16.xpose.msra.mxu1 %v476_v3  ;;  %v95_v3 = vld [vmem:[#allocation8 + $0x150] sm:$0xff]  ;;  %v238_v6 = vand.u32 2147483647, %v93_v2 }
  0x4d   :  { %479 = vmatprep.subr.bf16.mxu1 %v478_v4  ;;  %v98_v4 = vld [vmem:[#allocation8 + $0x168] sm:$0xff]  ;;  %v240_v7 = vand.u32 2147483647, %v95_v3  ;;  %v436_v10 = vpack.c.bf16 %v95_v3, %v93_v2 }
  0x4e   :  { %v243_v8 = vand.u32 2147483647, %v98_v4  ;;  %v438_v11 = vpack.c.bf16 %v100_v5, %v98_v4  ;;  %v119_v5 = vld [vmem:[#allocation5] sm:$0xff] }
  0x4f   :  { %v500_v12 = vpack.c.bf16 %v240_v7, %v238_v6 }
  0x52   :  { %417 = vmatpush1.bf16.xpose.msra.mxu0 %v416_v13  ;;  %v502_v13 = vpack.c.bf16 %v245_v9, %v243_v8 }
  0x53   :  { %419 = vmatprep.subr.bf16.mxu0 %v418_v14  ;;  %v97_v14 = vld [vmem:[#allocation8 + $0x160] sm:$0xff] }
  0x54   :  { %481 = vmatpush1.bf16.xpose.msra.mxu1 %v480_v15  ;;  %v99_v15 = vld [vmem:[#allocation8 + $0x170] sm:$0xff]  ;;  %v242_v18 = vand.u32 2147483647, %v97_v14 }
  0x55   :  { %483 = vmatprep.subr.bf16.mxu1 %v482_v16  ;;  %v102_v16 = vld [vmem:[#allocation8 + $0x188] sm:$0xff]  ;;  %v244_v19 = vand.u32 2147483647, %v99_v15  ;;  %v440_v22 = vpack.c.bf16 %v99_v15, %v97_v14  ;;  %v343_v14 = vstv %s685_s0  ;;  %s575_s0 = scalar_lea.vmem %s385_s18, 256 }
  0x56   :  { %v247_v20 = vand.u32 2147483647, %v102_v16  ;;  %v442_v23 = vpack.c.bf16 %v104_v17, %v102_v16  ;;  %p576_p2 = scmp.ne.s32.totalorder %s385_s18, %s575_s0  ;;  %p581_p4 = scmp.lt.s32.totalorder %s575_s0, %s575_s0 }
  0x57   :  { %v504_v24 = vpack.c.bf16 %v244_v19, %v242_v18 }
  0x58   :  { %p582_p5 = por %p581_p4, %p580_p3 }
  0x5a   :  { %421 = vmatpush1.bf16.xpose.msra.mxu0 %v420_v25  ;;  %v506_v25 = vpack.c.bf16 %v249_v21, %v247_v20  ;;  %p583_p6 = pnand %p582_p5, %p576_p2 }
  0x5b   :  { %423 = vmatprep.subr.bf16.mxu0 %v422_v26  ;;  %v101_v26 = vld [vmem:[#allocation8 + $0x180] sm:$0xff] }
  0x5c   :  { %485 = vmatpush1.bf16.xpose.msra.mxu1 %v484_v27  ;;  %v103_v27 = vld [vmem:[#allocation8 + $0x190] sm:$0xff]  ;;  %v246_v30 = vand.u32 2147483647, %v101_v26 }
  0x5d   :  { %487 = vmatprep.subr.bf16.mxu1 %v486_v28  ;;  %v106_v28 = vld [vmem:[#allocation8 + $0x1a8] sm:$0xff]  ;;  %v248_v31 = vand.u32 2147483647, %v103_v27  ;;  %v444_v34 = vpack.c.bf16 %v103_v27, %v101_v26 }
  0x5e   :  { %v251_v32 = vand.u32 2147483647, %v106_v28  ;;  %v446_v35 = vpack.c.bf16 %v108_v29, %v106_v28 }
  0x5f   :  { %v508_v36 = vpack.c.bf16 %v248_v31, %v246_v30 }
  0x62   :  { %425 = vmatpush1.bf16.xpose.msra.mxu0 %v424_v37  ;;  %v510_v37 = vpack.c.bf16 %v253_v33, %v251_v32 }
  0x63   :  { %427 = vmatprep.subr.bf16.mxu0 %v426_v38  ;;  %v105_v38 = vld [vmem:[#allocation8 + $0x1a0] sm:$0xff] }
  0x64   :  { %489 = vmatpush1.bf16.xpose.msra.mxu1 %v488_v39  ;;  %v107_v39 = vld [vmem:[#allocation8 + $0x1b0] sm:$0xff]  ;;  %v250_v42 = vand.u32 2147483647, %v105_v38 }
  0x65   :  { %491 = vmatprep.subr.bf16.mxu1 %v490_v40  ;;  %v110_v40 = vld [vmem:[#allocation8 + $0x1c8] sm:$0xff]  ;;  %v252_v43 = vand.u32 2147483647, %v107_v39  ;;  %v448_v46 = vpack.c.bf16 %v107_v39, %v105_v38 }
  0x66   :  { %v255_v44 = vand.u32 2147483647, %v110_v40  ;;  %v450_v47 = vpack.c.bf16 %v112_v41, %v110_v40 }
  0x67   :  { %v512_v48 = vpack.c.bf16 %v252_v43, %v250_v42 }
  0x6a   :  { %429 = vmatpush1.bf16.xpose.msra.mxu0 %v428_v49  ;;  %v514_v49 = vpack.c.bf16 %v257_v45, %v255_v44 }
  0x6b   :  { %431 = vmatprep.subr.bf16.mxu0 %v430_v50  ;;  %v109_v50 = vld [vmem:[#allocation8 + $0x1c0] sm:$0xff] }
  0x6c   :  { %493 = vmatpush1.bf16.xpose.msra.mxu1 %v492_v51  ;;  %v111_v51 = vld [vmem:[#allocation8 + $0x1d0] sm:$0xff]  ;;  %v254_v54 = vand.u32 2147483647, %v109_v50 }
  0x6d   :  { %495 = vmatprep.subr.bf16.mxu1 %v494_v52  ;;  %v114_v52 = vld [vmem:[#allocation8 + $0x1e8] sm:$0xff]  ;;  %v256_v55 = vand.u32 2147483647, %v111_v51  ;;  %v452_v58 = vpack.c.bf16 %v111_v51, %v109_v50 }
  0x6e   :  { %v259_v56 = vand.u32 2147483647, %v114_v52  ;;  %v454_v59 = vpack.c.bf16 %v116_v53, %v114_v52 }
  0x6f   :  { %v516_v60 = vpack.c.bf16 %v256_v55, %v254_v54 }
  0x72   :  { %433 = vmatpush1.bf16.xpose.msra.mxu0 %v432_v61  ;;  %v518_v61 = vpack.c.bf16 %v261_v57, %v259_v56 }
  0x73   :  { %435 = vmatprep.subr.bf16.mxu0 %v434_v62  ;;  %v113_v62 = vld [vmem:[#allocation8 + $0x1e0] sm:$0xff] }
  0x74   :  { %497 = vmatpush1.bf16.xpose.msra.mxu1 %v496_v63  ;;  %v115_v63 = vld [vmem:[#allocation8 + $0x1f0] sm:$0xff] }
  0x75   :  { %499 = vmatprep.subr.bf16.mxu1 %v498_v1  ;;  %v258_v1 = vand.u32 2147483647, %v113_v62  ;;  %v260_v2 = vand.u32 2147483647, %v115_v63  ;;  %v456_v3 = vpack.c.bf16 %v115_v63, %v113_v62 }
  0x77   :  { %v520_v4 = vpack.c.bf16 %v260_v2, %v258_v1 }
  0x7a   :  { %437 = vmatpush1.bf16.xpose.msra.mxu0 %v436_v10 }
  0x7b   :  { %439 = vmatprep.subr.bf16.mxu0 %v438_v11 }
  0x7c   :  { %501 = vmatpush1.bf16.xpose.msra.mxu1 %v500_v12  ;;  %v350_v12 = vlaneseq }
  0x7d   :  { %503 = vmatprep.subr.bf16.mxu1 %v502_v13 }
  0x7e   :  { %v351_v13 = vshrl.u32 %v350_v12, 7 }
  0x80   :  { %v352_v17 = vsub.s32 0, %v351_v13  ;;  %v356_v18 = vsub.s32 1, %v351_v13 }
  0x82   :  { %441 = vmatpush1.bf16.xpose.msra.mxu0 %v440_v22 }
  0x83   :  { %443 = vmatprep.subr.bf16.mxu0 %v442_v23 }
  0x84   :  { %505 = vmatpush1.bf16.xpose.msra.mxu1 %v504_v24 }
  0x85   :  { %507 = vmatprep.subr.bf16.mxu1 %v506_v25 }
  0x8a   :  { %445 = vmatpush1.bf16.xpose.msra.mxu0 %v444_v34 }
  0x8b   :  { %447 = vmatprep.subr.bf16.mxu0 %v446_v35 }
  0x8c   :  { %509 = vmatpush1.bf16.xpose.msra.mxu1 %v508_v36 }
  0x8d   :  { %511 = vmatprep.subr.bf16.mxu1 %v510_v37 }
  0x92   :  { %449 = vmatpush1.bf16.xpose.msra.mxu0 %v448_v46 }
  0x93   :  { %451 = vmatprep.subr.bf16.mxu0 %v450_v47 }
  0x94   :  { %513 = vmatpush1.bf16.xpose.msra.mxu1 %v512_v48 }
  0x95   :  { %515 = vmatprep.subr.bf16.mxu1 %v514_v49 }
  0x9a   :  { %453 = vmatpush1.bf16.xpose.msra.mxu0 %v452_v58 }
  0x9b   :  { %455 = vmatprep.subr.bf16.mxu0 %v454_v59 }
  0x9c   :  { %517 = vmatpush1.bf16.xpose.msra.mxu1 %v516_v60 }
  0x9d   :  { %519 = vmatprep.subr.bf16.mxu1 %v518_v61 }
  0xa2   :  { %457 = vmatpush1.bf16.xpose.msra.mxu0 %v456_v3 }
  0xa4   :  { %521 = vmatpush1.bf16.xpose.msra.mxu1 %v520_v4 }
  0xa9   :  { %186 = vmatmul.mubr.f32.vlgmr.msra.gmra.mrb[0].mxu0 %v119_v5 }
  0xab   :  { %327 = vmatmul.mubr.f32.vlgmr.msra.gmra.mrb[0].mxu1 %v607_v0  ;;  %v362_v0 = vld [vmem:[%s688_s3] sm:$0x3] }
  0xac   :  { %v367_v21 = vrot.slane %v362_v0, %v352_v17  ;;  %v371_v23 = vrot.slane %v362_v0, %v356_v18 }
 0x17c   :  { %v187_v6 = vpop.f32.mrb[0].mxu0 }
 0x17d   :  { %v189_v7 = vpop.f32.mrb[1].mxu0 }
 0x17e   :  { %v328_v8 = vpop.f32.mrb[0].mxu1 }
 0x17f   :  { %v330_v9 = vpop.f32.mrb[1].mxu1  ;;  %335 = vst [vmem:[#allocation3] sm:$0xff] %v328_v8 }
 0x180   :  { %336 = vst [vmem:[#allocation3 + $0x8] sm:$0xff] %v330_v9 }
 0x187   :  { %v340_v10 = vld [vmem:[#allocation3] ss:$8 sm:$0x3] }
 0x188   :  { %v341_v11 = vmax.f32 %v340_v10, 1e-16 }
 0x18a   :  { %529 = vrcp.f32 %v341_v11 }
 0x194   :  { %v530_v15 = vpop.eup %529 }
 0x195   :  { %v345_v16 = vmul.f32 %v530_v15, %v343_v14 }
 0x197   :  { %v346_v19 = vmin.f32 %v345_v16, 1.0 }
 0x199   :  { %v353_v20 = vrot.slane %v346_v19, %v352_v17  ;;  %v357_v22 = vrot.slane %v346_v19, %v356_v18 }
 0x19b   :  { %v360_v24 = vmul.f32 %v353_v20, %v187_v6  ;;  %v361_v25 = vmul.f32 %v357_v22, %v189_v7 }
 0x19d   :  { %v374_v26 = vadd.f32 %v367_v21, %v360_v24  ;;  %v375_v27 = vadd.f32 %v371_v23, %v361_v25 }
 0x19f   :  { %376 = vst [vmem:[#allocation10] sm:$0xff] %v374_v26  ;;  %377 = vst [vmem:[#allocation10 + $0x8] sm:$0xff] %v375_v27 }
 0x1a0   :  { %586 = shalt.err (!%p583_p6)
}
 0x1a1   :  { %s587_s20 = scalar_lea.hbm %s689_s4, 256 }
 0x1a2   :  { %p588_p7 = scmp.ne.s32.totalorder %s689_s4, %s587_s20  ;;  %p591_p8 = scmp.lt.u32.totalorder %s587_s20, %s689_s4 }
 0x1a4   :  { %p593_p9 = pnand %p591_p8, %p588_p7 }
 0x1a6   :  { %596 = shalt.err (!%p593_p9)
}
 0x1a7   :  { %387 = dma.vmem_to_hbm [thread:$0]  %s385_s18, 256, %s689_s4, [#allocation7]  }
 0x1a8   :  { %601 = dma.done.wait [#allocation7], 256  }
 0x1a9   :  { %602 = vsyncadd [#allocation7], 4294967040 }
 0x1aa   :  { %391 = vsyncpa [#allocation6], 1 }
 0x1ab   :  { %392 = vsyncpa [#allocation9], 1 }
 0x1ac   :  { %393 = vsyncpa [#allocation7], 1 }

</bundles_post_ra>
